<compile_context>
chip_gen: v5e
topology: v5e:2x2
jax: 0.10.0
libtpu: 0.0.40
codegen_flags: <defaults>
</compile_context>

<pallas_src>
import functools
import math

import jax
import jax.numpy as jnp
from jax import lax
from jax.experimental import pallas as pl
from jax.experimental.pallas import tpu as pltpu


def mca_gate_kernel(coef_ref, taps_ref, x_ref, o_ref, *, c, k):
    """One grid step over a (blk_rows, hw) slab; row index = batch*c + channel.

    coef_ref: SMEM (2,)  [0.5 + sigmoid(w0), 0.5 + sigmoid(w1)]
    taps_ref: SMEM (k,)  taps of Conv2d(1, 1, (1, k), bias=False)
    x_ref / o_ref: VMEM (blk_rows, hw) input / output tiles.
    """
    x = x_ref[...]                                        # native dtype
    r, hw = x.shape
    xf = x.astype(jnp.float32)

    # Pooled stats, two-pass (matches torch.std, unbiased ddof=1; the one-pass
    # sum/sum-sq form is cancellation-prone when |mean| >> std).
    s1 = jnp.sum(xf, axis=1, keepdims=True)               # (r, 1)
    mean = s1 * (1.0 / hw)
    diff = xf - mean                                      # lane-broadcast
    ssq = jnp.sum(diff * diff, axis=1, keepdims=True)     # (r, 1)
    std = jnp.sqrt(ssq * (1.0 / (hw - 1)))

    # 0.5*(avg+std) + sig(w0)*avg + sig(w1)*std  (coefficients folded host-side).
    v = coef_ref[0] * mean + coef_ref[1] * std            # (r, 1)

    # Channel conv ("same" zero padding, no bias).  Neighbouring channels are
    # adjacent rows; fetch them with sublane rotations + a channel-index mask.
    # The mask also zeroes cross-batch rows, roll wrap-around, and any padded
    # rows of a partial last block, so no contamination of valid outputs.
    pad = (k - 1) // 2
    ch = lax.broadcasted_iota(jnp.int32, (r, 1), 0) % c

    def shift_rows(arr, off):
        if r % 8 == 0:
            return pltpu.roll(arr, shift=(-off) % r, axis=0)   # arr[(i+off) % r]
        # Rare odd-row full-extent-block fallback: slice + zero pad (masked anyway).
        zp = jnp.zeros((abs(off), 1), jnp.float32)
        if off > 0:
            return jnp.concatenate([arr[off:, :], zp], axis=0)
        return jnp.concatenate([zp, arr[:off, :]], axis=0)

    conv = jnp.zeros((r, 1), jnp.float32)
    for t in range(k):                                     # k is tiny and static
        off = t - pad
        if off == 0:
            conv = conv + taps_ref[t] * v
        elif abs(off) < c:                                 # |off| >= c: fully masked
            valid = jnp.logical_and(ch + off >= 0, ch + off < c)
            conv = conv + taps_ref[t] * jnp.where(valid, shift_rows(v, off), 0.0)

    # TODO(synk): on v7x (VALU-tight) the (r, 1) gate chain could be repacked
    # lane-dense as (tb, c) with lane rolls; that needs an in-kernel
    # sublane->lane relayout of the pooled vector, left out for lowering safety.
    gate = jax.nn.sigmoid(conv).astype(x.dtype)            # (r, 1)
    o_ref[...] = x * gate                                  # full-width store


def mca_gate(x, weight, conv_w, *, max_block_bytes=2 << 20):
    """MCAGate forward.  x: (B, C, H, W); weight: (2,); conv_w: (k,) conv taps."""
    b, c, h, w = x.shape
    hw = h * w
    rows = b * c
    # NOTE: hw not a multiple of 128 still compiles/runs (block spans full hw),
    # just with masked lane stores; pad H*W upstream if that matters.
    x2 = x.reshape(rows, hw)

    # Host-side coefficient folding (once per call).
    sw = jax.nn.sigmoid(weight.astype(jnp.float32))
    coef = jnp.stack([0.5 + sw[0], 0.5 + sw[1]])           # (2,)
    taps = conv_w.astype(jnp.float32).reshape(-1)          # (k,)
    k = int(taps.shape[0])

    # Batches per block.  Each batch's C channels must stay in one block (the
    # channel conv mixes them).  Constraints, in priority order:
    #  * blk_rows = tb*c multiple of 8 sublanes, or a single full-extent block;
    #  * block bytes <= max_block_bytes (v5e scoped-VMEM safety; v6e may use 8MiB);
    #  * >= 2 grid steps when b >= 2 (both v7x TensorCores + DMA overlap).
    step = 8 // math.gcd(c, 8)                  # smallest tb with tb*c % 8 == 0
    per_batch_bytes = c * hw * x.dtype.itemsize
    tb = max(1, max_block_bytes // max(per_batch_bytes, 1))
    tb = min(tb, b)
    if b >= 2:
        tb = min(tb, -(-b // 2))                # ceil(b/2): guarantees grid >= 2
    tb = (tb // step) * step                    # 8-sublane-aligned blk_rows
    if tb == 0:
        tb = b                                  # single full-extent block (always legal)
    blk_rows = tb * c
    grid = (pl.cdiv(b, tb),)

    kern = functools.partial(mca_gate_kernel, c=c, k=k)
    out2 = pl.pallas_call(
        kern,
        out_shape=jax.ShapeDtypeStruct((rows, hw), x.dtype),
        grid=grid,
        in_specs=[
            pl.BlockSpec(memory_space=pltpu.MemorySpace.SMEM),   # coef (2,)
            pl.BlockSpec(memory_space=pltpu.MemorySpace.SMEM),   # conv taps (k,)
            pl.BlockSpec((blk_rows, hw), lambda i: (i, 0)),      # x rows per step
        ],
        out_specs=pl.BlockSpec((blk_rows, hw), lambda i: (i, 0)),
        compiler_params=pltpu.CompilerParams(
            dimension_semantics=("parallel",),
            vmem_limit_bytes=32 * 1024 * 1024),
        cost_estimate=pl.CostEstimate(
            flops=6 * rows * hw,
            transcendentals=2 * rows,
            bytes_accessed=2 * rows * hw * x.dtype.itemsize),
    )(coef, taps, x2)

    return out2.reshape(b, c, h, w)


def mca_gate_reference(x, weight, conv_w):
    """Pure-JAX reference mirroring the PyTorch forward."""
    b, c, h, w = x.shape
    k = conv_w.shape[0]
    pad = (k - 1) // 2
    xf = x.reshape(b, c, -1)
    avg = jnp.mean(xf, axis=2)                             # (b, c)
    std = jnp.std(xf, axis=2, ddof=1)                      # unbiased, like torch.std
    sw = jax.nn.sigmoid(weight)
    out = 0.5 * (avg + std) + sw[0] * avg + sw[1] * std    # (b, c)
    outp = jnp.pad(out, ((0, 0), (pad, pad)))
    conv = jnp.stack(
        [jnp.sum(conv_w * lax.dynamic_slice_in_dim(outp, i, k, axis=1), axis=1)
         for i in range(c)],
        axis=1,
    )                                                      # (b, c)
    gate = jax.nn.sigmoid(conv)[:, :, None, None]
    return x * gate


if __name__ == "__main__":
    root = jax.random.PRNGKey(0)

    def run_case(case_id, b, c, h, w, k_size):
        key = jax.random.fold_in(root, case_id)
        kx, kw, kc = jax.random.split(key, 3)
        # Non-zero mean so the two-pass std path is actually exercised.
        x = jax.random.normal(kx, (b, c, h, w), jnp.float32) + 0.7
        weight = jax.random.uniform(kw, (2,), jnp.float32)       # nn.Parameter(torch.rand(2))
        conv_w = jax.random.normal(kc, (k_size,), jnp.float32) * 0.5
        out = jax.block_until_ready(mca_gate(x, weight, conv_w))
        ref = mca_gate_reference(x, weight, conv_w)
        assert out.shape == (b, c, h, w)
        assert jnp.allclose(out, ref, rtol=1e-5, atol=1e-5), (
            f"mismatch vs reference in case {case_id} (b={b}, c={c}, k={k_size})")

    run_case(0, 2, 4, 16, 16, 3)   # c % 8 != 0 -> single full-extent block
    run_case(1, 2, 8, 16, 16, 3)   # two grid steps (one batch per block, both TCs on v7x)
    run_case(2, 3, 8, 16, 16, 5)   # partial last block + 5-tap conv
    print("KERNEL_OK")
</pallas_src>

<mosaic_0001>
module attributes {stable_mosaic.version = 11 : i64} {
  func.func @mca_gate_kernel(%arg0: i32, %arg1: memref<2xf32, #tpu.memory_space<smem>>, %arg2: memref<3xf32, #tpu.memory_space<smem>>, %arg3: memref<8x256xf32, #tpu.memory_space<vmem>>, %arg4: memref<8x256xf32, #tpu.memory_space<vmem>>) attributes {dimension_semantics = [#tpu.dimension_semantics<parallel>], iteration_bounds = array<i64: 1>, scalar_prefetch = 0 : i64, scratch_operands = 0 : i64, tpu.core_type = #tpu.core_type<tc>, window_params = [{transform_indices = @transform_0, window_bounds = array<i64: 2>}, {transform_indices = @transform_1, window_bounds = array<i64: 3>}, {transform_indices = @transform_2, window_bounds = array<i64: 8, 256>}, {transform_indices = @transform_3, window_bounds = array<i64: 8, 256>}]} {
    %c0 = arith.constant 0 : index
    %c0_0 = arith.constant 0 : index
    %0 = vector.load %arg3[%c0, %c0_0] : memref<8x256xf32, #tpu.memory_space<vmem>>, vector<8x256xf32>
    %cst = arith.constant dense<0.000000e+00> : vector<8xf32>
    %1 = vector.multi_reduction <add>, %0, %cst [1] : vector<8x256xf32> to vector<8xf32>
    %2 = vector.shape_cast %1 : vector<8xf32> to vector<8x1xf32>
    %cst_1 = arith.constant 3.906250e-03 : f32
    %3 = vector.broadcast %cst_1 : f32 to vector<8x1xf32>
    %4 = arith.mulf %2, %3 : vector<8x1xf32>
    %5 = vector.broadcast %4 : vector<8x1xf32> to vector<8x256xf32>
    %6 = arith.subf %0, %5 : vector<8x256xf32>
    %7 = arith.mulf %6, %6 : vector<8x256xf32>
    %cst_2 = arith.constant dense<0.000000e+00> : vector<8xf32>
    %8 = vector.multi_reduction <add>, %7, %cst_2 [1] : vector<8x256xf32> to vector<8xf32>
    %9 = vector.shape_cast %8 : vector<8xf32> to vector<8x1xf32>
    %cst_3 = arith.constant 0.00392156886 : f32
    %10 = vector.broadcast %cst_3 : f32 to vector<8x1xf32>
    %11 = arith.mulf %9, %10 : vector<8x1xf32>
    %12 = math.sqrt %11 : vector<8x1xf32>
    %c0_4 = arith.constant 0 : index
    %13 = memref.load %arg1[%c0_4] : memref<2xf32, #tpu.memory_space<smem>>
    %14 = vector.broadcast %13 : f32 to vector<8x1xf32>
    %15 = arith.mulf %14, %4 : vector<8x1xf32>
    %c1 = arith.constant 1 : index
    %16 = memref.load %arg1[%c1] : memref<2xf32, #tpu.memory_space<smem>>
    %17 = vector.broadcast %16 : f32 to vector<8x1xf32>
    %18 = arith.mulf %17, %12 : vector<8x1xf32>
    %19 = arith.addf %15, %18 : vector<8x1xf32>
    %20 = tpu.iota {dimensions = array<i32: 0>} : vector<8x1xi32>
    %c4_i32 = arith.constant 4 : i32
    %c0_i32 = arith.constant 0 : i32
    %21 = arith.cmpi eq, %c4_i32, %c0_i32 : i32
    %c1_i32 = arith.constant 1 : i32
    %22 = arith.select %21, %c1_i32, %c4_i32 : i32
    %23 = vector.broadcast %22 : i32 to vector<8x1xi32>
    %24 = arith.remsi %20, %23 : vector<8x1xi32>
    %c0_i32_5 = arith.constant 0 : i32
    %25 = vector.broadcast %c0_i32_5 : i32 to vector<8x1xi32>
    %26 = arith.cmpi ne, %24, %25 : vector<8x1xi32>
    %c0_i32_6 = arith.constant 0 : i32
    %27 = vector.broadcast %c0_i32_6 : i32 to vector<8x1xi32>
    %28 = arith.cmpi slt, %24, %27 : vector<8x1xi32>
    %c0_i32_7 = arith.constant 0 : i32
    %29 = arith.cmpi slt, %22, %c0_i32_7 : i32
    %30 = vector.broadcast %29 : i1 to vector<8x1xi1>
    %31 = vector.broadcast %30 : vector<8x1xi1> to vector<8x1xi1>
    %32 = arith.xori %28, %31 : vector<8x1xi1>
    %33 = arith.andi %32, %26 : vector<8x1xi1>
    %34 = vector.broadcast %22 : i32 to vector<8x1xi32>
    %35 = arith.addi %24, %34 : vector<8x1xi32>
    %36 = arith.select %33, %35, %24 : vector<8x1xi1>, vector<8x1xi32>
    %cst_8 = arith.constant 0.000000e+00 : f32
    %37 = vector.broadcast %cst_8 : f32 to vector<8x1xf32>
    %c-1_i32 = arith.constant -1 : i32
    %38 = vector.broadcast %c-1_i32 : i32 to vector<8x1xi32>
    %39 = arith.addi %36, %38 : vector<8x1xi32>
    %c0_i32_9 = arith.constant 0 : i32
    %40 = vector.broadcast %c0_i32_9 : i32 to vector<8x1xi32>
    %41 = arith.cmpi sge, %39, %40 : vector<8x1xi32>
    %c-1_i32_10 = arith.constant -1 : i32
    %42 = vector.broadcast %c-1_i32_10 : i32 to vector<8x1xi32>
    %43 = arith.addi %36, %42 : vector<8x1xi32>
    %c4_i32_11 = arith.constant 4 : i32
    %44 = vector.broadcast %c4_i32_11 : i32 to vector<8x1xi32>
    %45 = arith.cmpi slt, %43, %44 : vector<8x1xi32>
    %46 = arith.andi %41, %45 : vector<8x1xi1>
    %c0_12 = arith.constant 0 : index
    %47 = memref.load %arg2[%c0_12] : memref<3xf32, #tpu.memory_space<smem>>
    %c1_i32_13 = arith.constant 1 : i32
    %48 = tpu.dynamic_rotate %19 by %c1_i32_13 dim 0 : vector<8x1xf32>, i32 -> vector<8x1xf32>
    %cst_14 = arith.constant 0.000000e+00 : f32
    %49 = vector.broadcast %cst_14 : f32 to vector<8x1xf32>
    %50 = arith.select %46, %48, %49 : vector<8x1xi1>, vector<8x1xf32>
    %51 = vector.broadcast %47 : f32 to vector<8x1xf32>
    %52 = arith.mulf %51, %50 : vector<8x1xf32>
    %53 = arith.addf %37, %52 : vector<8x1xf32>
    %c1_15 = arith.constant 1 : index
    %54 = memref.load %arg2[%c1_15] : memref<3xf32, #tpu.memory_space<smem>>
    %55 = vector.broadcast %54 : f32 to vector<8x1xf32>
    %56 = arith.mulf %55, %19 : vector<8x1xf32>
    %57 = arith.addf %53, %56 : vector<8x1xf32>
    %c1_i32_16 = arith.constant 1 : i32
    %58 = vector.broadcast %c1_i32_16 : i32 to vector<8x1xi32>
    %59 = arith.addi %36, %58 : vector<8x1xi32>
    %c0_i32_17 = arith.constant 0 : i32
    %60 = vector.broadcast %c0_i32_17 : i32 to vector<8x1xi32>
    %61 = arith.cmpi sge, %59, %60 : vector<8x1xi32>
    %c1_i32_18 = arith.constant 1 : i32
    %62 = vector.broadcast %c1_i32_18 : i32 to vector<8x1xi32>
    %63 = arith.addi %36, %62 : vector<8x1xi32>
    %c4_i32_19 = arith.constant 4 : i32
    %64 = vector.broadcast %c4_i32_19 : i32 to vector<8x1xi32>
    %65 = arith.cmpi slt, %63, %64 : vector<8x1xi32>
    %66 = arith.andi %61, %65 : vector<8x1xi1>
    %c2 = arith.constant 2 : index
    %67 = memref.load %arg2[%c2] : memref<3xf32, #tpu.memory_space<smem>>
    %c7_i32 = arith.constant 7 : i32
    %68 = tpu.dynamic_rotate %19 by %c7_i32 dim 0 : vector<8x1xf32>, i32 -> vector<8x1xf32>
    %cst_20 = arith.constant 0.000000e+00 : f32
    %69 = vector.broadcast %cst_20 : f32 to vector<8x1xf32>
    %70 = arith.select %66, %68, %69 : vector<8x1xi1>, vector<8x1xf32>
    %71 = vector.broadcast %67 : f32 to vector<8x1xf32>
    %72 = arith.mulf %71, %70 : vector<8x1xf32>
    %73 = arith.addf %57, %72 : vector<8x1xf32>
    %74 = arith.negf %73 : vector<8x1xf32>
    %75 = math.exp %74 : vector<8x1xf32>
    %cst_21 = arith.constant 1.000000e+00 : f32
    %76 = vector.broadcast %cst_21 : f32 to vector<8x1xf32>
    %77 = arith.addf %76, %75 : vector<8x1xf32>
    %78 = arith.divf %76, %77 : vector<8x1xf32>
    %79 = vector.broadcast %78 : vector<8x1xf32> to vector<8x256xf32>
    %80 = arith.mulf %0, %79 : vector<8x256xf32>
    %c0_22 = arith.constant 0 : index
    %c0_23 = arith.constant 0 : index
    %81 = vector.load %arg4[%c0_22, %c0_23] : memref<8x256xf32, #tpu.memory_space<vmem>>, vector<8x256xf32>
    tpu.vector_store %arg4[%c0_22, %c0_23], %80 {strides = array<i32>} : memref<8x256xf32, #tpu.memory_space<vmem>>, vector<8x256xf32>,
    return
  }
  func.func @transform_0(%arg0: i32) -> i32 {
    %c0_i32 = arith.constant 0 : i32
    %c0_i32_0 = arith.constant 0 : i32
    return %c0_i32 : i32
  }
  func.func @transform_1(%arg0: i32) -> i32 {
    %c0_i32 = arith.constant 0 : i32
    %c0_i32_0 = arith.constant 0 : i32
    return %c0_i32 : i32
  }
  func.func @transform_2(%arg0: i32) -> (i32, i32) {
    %c0_i32 = arith.constant 0 : i32
    %c0_i32_0 = arith.constant 0 : i32
    return %arg0, %c0_i32 : i32, i32
  }
  func.func @transform_3(%arg0: i32) -> (i32, i32) {
    %c0_i32 = arith.constant 0 : i32
    %c0_i32_0 = arith.constant 0 : i32
    return %arg0, %c0_i32 : i32, i32
  }
}

</mosaic_0001>

<bundles_post_ra>
// kernel: tpu_custom_call.1
= control target key start
LH: loop header
LB: loop body
LE: loop exit
PB: predicated region body
PF: predicated region fallthrough
CT: control target
= control target key end

     0   :  { %8 = vsyncpa [#allocation5], 0  ;;  %s316_s0 = inlined_call_operand.hbm [shape: f32[2], index: 0, kind: input, shape index: {}]   ;;  %s317_s1 = inlined_call_operand.hbm [shape: f32[3], index: 1, kind: input, shape index: {}]   ;;  %s318_s2 = inlined_call_operand.hbm [shape: f32[8,256], index: 2, kind: input, shape index: {}]   ;;  %s319_s3 = inlined_call_operand.hbm [shape: f32[8,256], index: 3, kind: output, shape index: {}]  }
   0x1   :  { %9 = vsyncpa [#allocation7], 0 }
   0x2   :  { %10 = vsyncpa [#allocation3], 0 }
   0x3   :  { %11 = vsyncpa [#allocation4], 0  ;;  %s17_s14 = sshll.u32 %s316_s0, 4  ;;  %s26_s17 = sshll.u32 %s317_s1, 4  ;;  %s18_s14 = int_to_ptr.hbm [resolvable:$true] %s17_s14  ;;  %s27_s17 = int_to_ptr.hbm [resolvable:$true] %s26_s17 }
   0x4   :  { %s269_s18 = smov [#allocation2]   ;;  %s270_s19 = smov [#allocation6]  }
   0x5   :  { %20 = dma.hbm_to_smem %s18_s14, 16, %s269_s18, [#allocation5]  }
   0x6   :  { %29 = dma.hbm_to_smem %s27_s17, 16, %s270_s19, [#allocation7]  }
   0x7   :  { %s35_s22 = sshll.u32 %s318_s2, 4  ;;  %s271_s23 = smov [#allocation8]   ;;  %s36_s22 = int_to_ptr.hbm [resolvable:$true] %s35_s22 }
   0x8   :  { %s37_s24 = sshll.u32 %s271_s23, 4  ;;  %s38_s24 = int_to_ptr.vmem [resolvable:$true] %s37_s24 }
   0x9   :  { %40 = dma.hbm_to_vmem [thread:$0]  %s36_s22, 256, %s38_s24, [#allocation3]  }
   0xa   :  { %261 = dma.done.wait [#allocation5], 16  }
   0xb   :  { %262 = vsyncadd [#allocation5], 4294967280 }
   0xc   :  { %263 = dma.done.wait [#allocation7], 16  }
   0xd   :  { %264 = vsyncadd [#allocation7], 4294967280 }
   0xe   :  { %265 = dma.done.wait [#allocation3], 256  }
   0xf   :  { %266 = vsyncadd [#allocation3], 4294967040 }
  0x10   :  { %53 = sfence }
  0x11   :  { %v303_v0 = vld [vmem:[#allocation8] sm:$0xff]  ;;  %v305_v1 = vld [vmem:[#allocation8 + $0x8] sm:$0xff]  ;;  %v272_v10 = vmov 0   ;;  %v87_v15 = vlaneseq  ;;  %s80_s0 = sld [smem:[#allocation2]]  ;;  %s273_s27 = smov [#allocation9]  }
  0x12   :  { %v56_v2 = vadd.f32 %v305_v1, %v303_v0  ;;  %181 = vset.pattern.permute.xlu1 %v272_v10  ;;  %182 = vset.pattern.permute.xlu0 %v272_v10  ;;  %s172_s1 = sld [smem:[#allocation2 + $0x1]]  ;;  %s158_s28 = sshll.u32 %s273_s27, 4  ;;  %s159_s28 = int_to_ptr.vmem [resolvable:$true] %s158_s28 }
  0x13   :  { %v88_v18 = vshrl.u32 %v87_v15, 7  ;;  %s173_s2 = sld [smem:[#allocation6 + $0x1]]  ;;  %s160_s4 = sshll.u32 %s319_s3, 4  ;;  %s161_s4 = int_to_ptr.hbm [resolvable:$true] %s160_s4 }
  0x14   :  { %57 = vadd.xlane.f32.xlu0 %v56_v2  ;;  %s105_s25 = sld [smem:[#allocation6]] }
  0x15   :  { %v93_v21 = vand.u32 3, %v88_v18  ;;  %s174_s26 = sld [smem:[#allocation6 + $0x2]] }
  0x17   :  { %v81_v23 = vstv %s80_s0  ;;  %v101_v28 = vadd.s32 4294967295, %v93_v21  ;;  %v115_v29 = vadd.s32 1, %v93_v21 }
  0x18   :  { %v84_v24 = vstv %s172_s1 }
  0x19   :  { %vm102_vm2 = vcmp.ge.s32.totalorder %v101_v28, 0  ;;  %vm117_vm3 = vcmp.lt.s32.totalorder %v115_v29, 4  ;;  %v112_v35 = vstv %s173_s2 }
  0x1a   :  { %v108_v34 = vstv %s105_s25 }
  0x1b   :  { %v122_v39 = vstv %s174_s26 }
  0x87   :  { %v58_v3 = vpop.xlane.xlu0 %57 }
  0x88   :  { %v59_v4 = vmul.f32 0.00390625, %v58_v3 }
  0x8a   :  { %v60_v5 = vsub.f32 %v303_v0, %v59_v4  ;;  %v61_v6 = vsub.f32 %v305_v1, %v59_v4  ;;  %v82_v30 = vmul.f32 %v81_v23, %v59_v4 }
  0x8c   :  { %v62_v7 = vmul.f32 %v60_v5, %v60_v5  ;;  %v63_v8 = vmul.f32 %v61_v6, %v61_v6 }
  0x8e   :  { %v64_v9 = vadd.f32 %v63_v8, %v62_v7 }
  0x90   :  { %65 = vadd.xlane.f32.xlu0 %v64_v9 }
 0x103   :  { %v66_v11 = vpop.xlane.xlu0 %65 }
 0x104   :  { %v67_v12 = vmul.f32 0.003921569, %v66_v11 }
 0x106   :  { %183 = vrsqrt.f32 %v67_v12  ;;  %vm75_vm0 = vcmp.eq.f32.partialorder %v67_v12, inf  ;;  %v78_v25 = vand.u32 2147483648, %v67_v12  ;;  %vm77_vm1 = vcmp.eq.f32.partialorder %v67_v12, 0.0 }
 0x10c   :  { %v184_v13 = vpop.eup %183 }
 0x10d   :  { %v69_v14 = vmul.f32 %v184_v13, %v67_v12 }
 0x10f   :  { %v70_v16 = vmul.f32 %v184_v13, %v69_v14 }
 0x111   :  { %v71_v17 = vmul.f32 0.5, %v70_v16 }
 0x113   :  { %v72_v19 = vsub.f32 1.5, %v71_v17 }
 0x115   :  { %v73_v20 = vmul.f32 %v184_v13, %v72_v19 }
 0x117   :  { %v74_v22 = vmul.f32 %v73_v20, %v67_v12 }
 0x119   :  { %v76_v26 = vsel %vm75_vm0, %v67_v12, %v74_v22 }
 0x11a   :  { %v79_v27 = vsel %vm77_vm1, %v78_v25, %v76_v26 }
 0x11b   :  { %v85_v31 = vmul.f32 %v84_v24, %v79_v27 }
 0x11d   :  { %v86_v32 = vadd.f32 %v85_v31, %v82_v30 }
 0x11f   :  { %v106_v33 = vrot.slane %v86_v32, 7  ;;  %v120_v36 = vrot.slane %v86_v32, 1  ;;  %v113_v41 = vmul.f32 %v112_v35, %v86_v32 }
 0x121   :  { %v107_v37 = vsel %vm102_vm2, %v106_v33, 0.0  ;;  %v121_v38 = vsel %vm117_vm3, %v120_v36, 0.0 }
 0x122   :  { %v109_v40 = vmul.f32 %v108_v34, %v107_v37  ;;  %v123_v43 = vmul.f32 %v122_v39, %v121_v38 }
 0x124   :  { %v114_v42 = vadd.f32 %v113_v41, %v109_v40 }
 0x126   :  { %v124_v44 = vadd.f32 %v123_v43, %v114_v42 }
 0x128   :  { %v175_v45 = vmul.f32 -1.442695, %v124_v44 }
 0x12a   :  { %185 = vpow2.f32 %v175_v45 }
 0x130   :  { %v186_v46 = vpop.eup %185 }
 0x131   :  { %v128_v47 = vadd.f32 1.0, %v186_v46 }
 0x133   :  { %187 = vrcp.f32 %v128_v47  ;;  %v140_v51 = vand.u32 2147483648, %v128_v47  ;;  %v138_v53 = vand.u32 2147483647, %v128_v47  ;;  %vm134_vm5 = vweird.f32 %v128_v47 }
 0x135   :  { %v141_v55 = vor.u32 1.1754944e-38, %v140_v51  ;;  %vm139_vm7 = vcmp.eq.f32.partialorder %v138_v53, 8.507059e+37 }
 0x139   :  { %v188_v48 = vpop.eup %187 }
 0x13a   :  { %v130_v49 = vmul.f32 %v188_v48, %v128_v47  ;;  %vm135_vm4 = vweird.f32 %v188_v48 }
 0x13b   :  { %vm136_vm6 = vmor %vm134_vm5, %vm135_vm4 }
 0x13c   :  { %v131_v50 = vsub.f32 1.0, %v130_v49 }
 0x13e   :  { %v132_v52 = vmul.f32 %v188_v48, %v131_v50 }
 0x140   :  { %v133_v54 = vadd.f32 %v188_v48, %v132_v52 }
 0x142   :  { %v137_v56 = vsel %vm136_vm6, %v188_v48, %v133_v54 }
 0x143   :  { %v142_v57 = vsel %vm139_vm7, %v141_v55, %v137_v56 }
 0x144   :  { %146 = vperm.xlu1 %181, %v142_v57  }
 0x1b6   :  { %v147_v58 = vpop.permute.xlu1 %146 }
 0x1b7   :  { %v149_v59 = vmul.f32 %v147_v58, %v303_v0  ;;  %v150_v60 = vmul.f32 %v147_v58, %v305_v1 }
 0x1b9   :  { %151 = vst [vmem:[#allocation9] sm:$0xff] %v149_v59 }
 0x1ba   :  { %152 = vst [vmem:[#allocation9 + $0x8] sm:$0xff] %v150_v60 }
 0x1bb   :  { %163 = dma.vmem_to_hbm [thread:$0]  %s159_s28, 256, %s161_s4, [#allocation4]  }
 0x1bc   :  { %267 = dma.done.wait [#allocation4], 256  }
 0x1bd   :  { %268 = vsyncadd [#allocation4], 4294967040 }
 0x1be   :  { %168 = vsyncpa [#allocation3], 1 }
 0x1bf   :  { %169 = vsyncpa [#allocation4], 1 }
 0x1c0   :  { %170 = vsyncpa [#allocation5], 1 }
 0x1c1   :  { %171 = vsyncpa [#allocation7], 1 }

</bundles_post_ra>
